<compile_context>
chip_gen: v7x
topology: tpu7x:2x2x1
jax: 0.10.0
libtpu: 0.0.40
codegen_flags: <defaults>
</compile_context>

<pallas_src>
import jax
import jax.numpy as jnp
from jax.experimental import pallas as pl
from jax.experimental.pallas import tpu as pltpu

# ---- model hyper-parameters (small, consistent with the module) ----
B = 2        # batch
S = 8        # sequence length
D = 32       # d_model ("size")
H = 4        # attention heads
DK = D // H  # 8
DFF = 64     # feed-forward hidden dim
EPS = 1e-5   # torch.nn.LayerNorm default eps
NEG_INF = -1e9
SCALE = 1.0 / (DK ** 0.5)

SLAB_ROWS = 24   # (24, 128) f32: row 0 = qkvo bias, row 1 = ffn bias,
MASK_ROW = 8     # rows 8..23 lanes 0..15 = combined causal/batch mask


def decoder_layer_kernel(x_ref, wqkvo_ref, w1_ref, w2_ref, slab_ref, o_ref):
    x = x_ref[...]                       # (B*S, D)  f32
    w_qkvo = wqkvo_ref[...]              # (D, 4D)   bf16: [s*g1*Wq|g1*Wk|g1*Wv|Wo]
    slab = slab_ref[...]                 # (24, 4D)  f32
    bias_qkvo = slab[0:1, :]             # (1, 4D)   [s*bq'|bk'|bv'|bo]
    bias_ffn = slab[1:2, :]              # (1, 4D)   [b1 (64) | b2 (32) | 0]
    mask = slab[MASK_ROW:MASK_ROW + B * S, 0:B * S]   # (16,16) additive mask

    # ---- sublayer 0: pre-norm (gamma/beta folded offline) + causal MHA ----
    mu = jnp.mean(x, axis=-1, keepdims=True)
    var = jnp.mean((x - mu) ** 2, axis=-1, keepdims=True)
    xn = (x - mu) * jax.lax.rsqrt(var + EPS)                  # (B*S, D) f32

    # one lane-dense 128-wide MXU push (the Wo columns of the result are unused)
    fused = jnp.dot(xn.astype(jnp.bfloat16), w_qkvo,
                    preferred_element_type=jnp.float32)       # (B*S, 4D) f32
    fused = fused + bias_qkvo
    q = fused[:, 0 * D:1 * D].astype(jnp.bfloat16)            # scale pre-folded
    k = fused[:, 1 * D:2 * D].astype(jnp.bfloat16)
    v = fused[:, 2 * D:3 * D].astype(jnp.bfloat16)

    # H=4 head steps over all B*S rows at once; the combined mask kills both
    # cross-batch and non-causal entries.  No reshapes, no concatenates.
    attn = None
    for h in range(H):
        c = h * DK
        qh = q[:, c:c + DK]                                   # (16, 8) bf16
        kh = k[:, c:c + DK]
        vh = v[:, c:c + DK]
        s = jax.lax.dot_general(                              # q @ k^T -> (16,16)
            qh, kh, (((1,), (1,)), ((), ())),
            preferred_element_type=jnp.float32)
        s = s + mask                                          # f32 softmax math
        m = jnp.max(s, axis=-1, keepdims=True)
        e = jnp.exp(s - m)
        p = e * pl.reciprocal(jnp.sum(e, axis=-1, keepdims=True), approx=True)
        ctx_h = jnp.dot(p.astype(jnp.bfloat16), vh,
                        preferred_element_type=jnp.float32)   # (16, 8) f32
        contrib = jnp.dot(ctx_h.astype(jnp.bfloat16),         # (16, D) f32
                          w_qkvo[c:c + DK, 3 * D:4 * D],
                          preferred_element_type=jnp.float32)
        attn = contrib if attn is None else attn + contrib
    attn = attn + bias_qkvo[:, 3 * D:4 * D]
    hres = x + attn                                           # residual (dropout = id)

    # ---- sublayer 1: pre-norm + position-wise feed-forward ----
    mu2 = jnp.mean(hres, axis=-1, keepdims=True)
    var2 = jnp.mean((hres - mu2) ** 2, axis=-1, keepdims=True)
    hn = (hres - mu2) * jax.lax.rsqrt(var2 + EPS)

    ff = jnp.dot(hn.astype(jnp.bfloat16), w1_ref[...],
                 preferred_element_type=jnp.float32) + bias_ffn[:, 0:DFF]
    ff = jnp.maximum(ff, 0.0)
    ff = jnp.dot(ff.astype(jnp.bfloat16), w2_ref[...],
                 preferred_element_type=jnp.float32) + bias_ffn[:, DFF:DFF + D]

    o_ref[...] = hres + ff


def make_params(key):
    ks = jax.random.split(key, 16)
    sd = 1.0 / (D ** 0.5)
    sf = 1.0 / (DFF ** 0.5)
    n = lambda i, shape, s=1.0: s * jax.random.normal(ks[i], shape, jnp.float32)
    return dict(
        ln1_g=1.0 + 0.1 * n(0, (1, D)), ln1_b=0.1 * n(1, (1, D)),
        wq=n(2, (D, D), sd), bq=0.1 * n(3, (1, D)),
        wk=n(4, (D, D), sd), bk=0.1 * n(5, (1, D)),
        wv=n(6, (D, D), sd), bv=0.1 * n(7, (1, D)),
        wo=n(8, (D, D), sd), bo=0.1 * n(9, (1, D)),
        ln2_g=1.0 + 0.1 * n(10, (1, D)), ln2_b=0.1 * n(11, (1, D)),
        w1=n(12, (D, DFF), sd), b1=0.1 * n(13, (1, DFF)),
        w2=n(14, (DFF, D), sf), b2=0.1 * n(15, (1, D)),
    )


def pack_params(p):
    """Offline: fold LN gamma/beta + 1/sqrt(DK) into the following matmuls and
    pack the 16 parameter tensors + causal mask into 4 operands."""
    g1 = p["ln1_g"].reshape(D, 1)
    bt1 = p["ln1_b"].reshape(1, D)
    g2 = p["ln2_g"].reshape(D, 1)
    bt2 = p["ln2_b"].reshape(1, D)

    # LN1 gamma/beta folded into Q/K/V; softmax scale folded into Q; Wo raw.
    w_qkvo = jnp.concatenate(
        [SCALE * g1 * p["wq"], g1 * p["wk"], g1 * p["wv"], p["wo"]],
        axis=1)                                                       # (D, 4D)
    b_qkvo = jnp.concatenate(
        [SCALE * (bt1 @ p["wq"] + p["bq"]),
         bt1 @ p["wk"] + p["bk"],
         bt1 @ p["wv"] + p["bv"],
         p["bo"]], axis=1)                                            # (1, 4D)

    # LN2 gamma/beta folded into W1/b1.
    w1 = g2 * p["w1"]                                                 # (D, DFF)
    b1 = bt2 @ p["w1"] + p["b1"]                                      # (1, DFF)
    b_ffn = jnp.concatenate(
        [b1, p["b2"], jnp.zeros((1, 4 * D - DFF - D), jnp.float32)],
        axis=1)                                                       # (1, 4D)

    # Combined causal + batch-block-diagonal additive mask over B*S rows.
    ids = jnp.arange(B * S)
    b_i = ids // S
    s_i = ids % S
    ok = (b_i[:, None] == b_i[None, :]) & (s_i[None, :] <= s_i[:, None])
    mask = jnp.where(ok, 0.0, NEG_INF).astype(jnp.float32)            # (16, 16)

    slab = jnp.zeros((SLAB_ROWS, 4 * D), jnp.float32)
    slab = slab.at[0, :].set(b_qkvo[0].astype(jnp.float32))
    slab = slab.at[1, :].set(b_ffn[0].astype(jnp.float32))
    slab = slab.at[MASK_ROW:MASK_ROW + B * S, 0:B * S].set(mask)

    return (w_qkvo.astype(jnp.bfloat16),
            w1.astype(jnp.bfloat16),
            p["w2"].astype(jnp.bfloat16),
            slab)


@jax.jit
def self_attention_decoder_layer(x, w_qkvo, w1, w2, slab):
    """x: (B, S, D) f32 -> (B, S, D) f32."""
    x2 = x.reshape(B * S, D)
    vmem = lambda: pl.BlockSpec(memory_space=pltpu.MemorySpace.VMEM)
    out = pl.pallas_call(
        decoder_layer_kernel,
        out_shape=jax.ShapeDtypeStruct((B * S, D), jnp.float32),
        in_specs=[vmem(), vmem(), vmem(), vmem(), vmem()],
        out_specs=vmem(),
    )(x2, w_qkvo, w1, w2, slab)
    return out.reshape(B, S, D)


def _reference(x, p):
    # pure-JAX f32 reference of the PyTorch module (pre-norm, eval mode)
    def ln(v, g, b):
        mu = jnp.mean(v, -1, keepdims=True)
        var = jnp.mean((v - mu) ** 2, -1, keepdims=True)
        return (v - mu) * jax.lax.rsqrt(var + EPS) * g + b

    xn = ln(x, p["ln1_g"], p["ln1_b"])
    q = (xn @ p["wq"] + p["bq"]).reshape(B, S, H, DK)
    k = (xn @ p["wk"] + p["bk"]).reshape(B, S, H, DK)
    v = (xn @ p["wv"] + p["bv"]).reshape(B, S, H, DK)
    scores = jnp.einsum("bqhd,bkhd->bhqk", q, k) / (DK ** 0.5)
    causal = jnp.tril(jnp.ones((S, S), bool))[None, None]
    scores = jnp.where(causal, scores, NEG_INF)
    pattn = jax.nn.softmax(scores, axis=-1)
    ctx = jnp.einsum("bhqk,bkhd->bqhd", pattn, v).reshape(B, S, D)
    h = x + ctx @ p["wo"] + p["bo"]
    hn = ln(h, p["ln2_g"], p["ln2_b"])
    ff = jnp.maximum(hn @ p["w1"] + p["b1"], 0.0) @ p["w2"] + p["b2"]
    return h + ff


if __name__ == "__main__":
    key = jax.random.PRNGKey(0)
    kx, kp = jax.random.split(key)
    x = jax.random.normal(kx, (B, S, D), jnp.float32)
    params = make_params(kp)
    packed = pack_params(params)

    out = jax.block_until_ready(self_attention_decoder_layer(x, *packed))
    ref = _reference(x, params)

    assert out.shape == (B, S, D)
    err = float(jnp.max(jnp.abs(out - ref)))
    # bf16 MXU operands throughout (projections + score/p@v matmuls) ->
    # tolerance loosened vs the f32 reference.
    assert jnp.allclose(out, ref, atol=5e-2, rtol=5e-2), (
        f"mismatch vs reference, max |err|={err}")

    # TODO(synk): dropout is a no-op here (eval mode); training-mode dropout
    # would need pltpu.prng_* masks inside the kernel.
    print("KERNEL_OK")
</pallas_src>

<mosaic_0001>
module attributes {stable_mosaic.version = 11 : i64} {
  func.func @decoder_layer_kernel(%arg0: memref<16x32xf32, #tpu.memory_space<vmem>>, %arg1: memref<32x128xbf16, #tpu.memory_space<vmem>>, %arg2: memref<32x64xbf16, #tpu.memory_space<vmem>>, %arg3: memref<64x32xbf16, #tpu.memory_space<vmem>>, %arg4: memref<24x128xf32, #tpu.memory_space<vmem>>, %arg5: memref<16x32xf32, #tpu.memory_space<vmem>>) attributes {dimension_semantics = [], scalar_prefetch = 0 : i64, scratch_operands = 0 : i64, tpu.core_type = #tpu.core_type<tc>} {
    %c0 = arith.constant 0 : index
    %c0_0 = arith.constant 0 : index
    %0 = vector.load %arg0[%c0, %c0_0] : memref<16x32xf32, #tpu.memory_space<vmem>>, vector<16x32xf32>
    %c0_1 = arith.constant 0 : index
    %c0_2 = arith.constant 0 : index
    %1 = vector.load %arg1[%c0_1, %c0_2] : memref<32x128xbf16, #tpu.memory_space<vmem>>, vector<32x128xbf16>
    %c0_3 = arith.constant 0 : index
    %c0_4 = arith.constant 0 : index
    %2 = vector.load %arg4[%c0_3, %c0_4] : memref<24x128xf32, #tpu.memory_space<vmem>>, vector<24x128xf32>
    %3 = vector.extract_strided_slice %2 {offsets = [0, 0], sizes = [1, 128], strides = [1, 1]} : vector<24x128xf32> to vector<1x128xf32>
    %4 = vector.extract_strided_slice %2 {offsets = [1, 0], sizes = [1, 128], strides = [1, 1]} : vector<24x128xf32> to vector<1x128xf32>
    %5 = vector.extract_strided_slice %2 {offsets = [8, 0], sizes = [16, 16], strides = [1, 1]} : vector<24x128xf32> to vector<16x16xf32>
    %cst = arith.constant dense<0.000000e+00> : vector<16xf32>
    %6 = vector.multi_reduction <add>, %0, %cst [1] : vector<16x32xf32> to vector<16xf32>
    %7 = vector.shape_cast %6 : vector<16xf32> to vector<16x1xf32>
    %cst_5 = arith.constant 3.200000e+01 : f32
    %8 = vector.broadcast %cst_5 : f32 to vector<16x1xf32>
    %9 = arith.divf %7, %8 : vector<16x1xf32>
    %10 = vector.broadcast %9 : vector<16x1xf32> to vector<16x32xf32>
    %11 = arith.subf %0, %10 : vector<16x32xf32>
    %12 = arith.mulf %11, %11 : vector<16x32xf32>
    %cst_6 = arith.constant dense<0.000000e+00> : vector<16xf32>
    %13 = vector.multi_reduction <add>, %12, %cst_6 [1] : vector<16x32xf32> to vector<16xf32>
    %14 = vector.shape_cast %13 : vector<16xf32> to vector<16x1xf32>
    %cst_7 = arith.constant 3.200000e+01 : f32
    %15 = vector.broadcast %cst_7 : f32 to vector<16x1xf32>
    %16 = arith.divf %14, %15 : vector<16x1xf32>
    %17 = vector.broadcast %9 : vector<16x1xf32> to vector<16x32xf32>
    %18 = arith.subf %0, %17 : vector<16x32xf32>
    %cst_8 = arith.constant 9.99999974E-6 : f32
    %19 = vector.broadcast %cst_8 : f32 to vector<16x1xf32>
    %20 = arith.addf %16, %19 : vector<16x1xf32>
    %21 = math.rsqrt %20 : vector<16x1xf32>
    %22 = vector.broadcast %21 : vector<16x1xf32> to vector<16x32xf32>
    %23 = arith.mulf %18, %22 : vector<16x32xf32>
    %24 = arith.truncf %23 : vector<16x32xf32> to vector<16x32xbf16>
    %cst_9 = arith.constant dense<0.000000e+00> : vector<16x128xf32>
    %25 = tpu.matmul %24, %1, %cst_9 {dimension_numbers = #tpu.dot_dimension_numbers<[1], [0], [0], [1], [0, 0, 1, 1], [], []>} : vector<16x32xbf16>, vector<32x128xbf16>, vector<16x128xf32> -> vector<16x128xf32>
    %26 = vector.broadcast %3 : vector<1x128xf32> to vector<16x128xf32>
    %27 = arith.addf %25, %26 : vector<16x128xf32>
    %28 = vector.extract_strided_slice %27 {offsets = [0, 0], sizes = [16, 32], strides = [1, 1]} : vector<16x128xf32> to vector<16x32xf32>
    %29 = arith.truncf %28 : vector<16x32xf32> to vector<16x32xbf16>
    %30 = vector.extract_strided_slice %27 {offsets = [0, 32], sizes = [16, 32], strides = [1, 1]} : vector<16x128xf32> to vector<16x32xf32>
    %31 = arith.truncf %30 : vector<16x32xf32> to vector<16x32xbf16>
    %32 = vector.extract_strided_slice %27 {offsets = [0, 64], sizes = [16, 32], strides = [1, 1]} : vector<16x128xf32> to vector<16x32xf32>
    %33 = arith.truncf %32 : vector<16x32xf32> to vector<16x32xbf16>
    %34 = vector.extract_strided_slice %29 {offsets = [0, 0], sizes = [16, 8], strides = [1, 1]} : vector<16x32xbf16> to vector<16x8xbf16>
    %35 = vector.extract_strided_slice %31 {offsets = [0, 0], sizes = [16, 8], strides = [1, 1]} : vector<16x32xbf16> to vector<16x8xbf16>
    %36 = vector.extract_strided_slice %33 {offsets = [0, 0], sizes = [16, 8], strides = [1, 1]} : vector<16x32xbf16> to vector<16x8xbf16>
    %cst_10 = arith.constant dense<0.000000e+00> : vector<16x16xf32>
    %37 = tpu.matmul %34, %35, %cst_10 {dimension_numbers = #tpu.dot_dimension_numbers<[1], [1], [0], [0], [0, 0, 1, 0], [], []>} : vector<16x8xbf16>, vector<16x8xbf16>, vector<16x16xf32> -> vector<16x16xf32>
    %38 = arith.addf %37, %5 : vector<16x16xf32>
    %cst_11 = arith.constant dense<0xFF800000> : vector<16xf32>
    %39 = vector.multi_reduction <maximumf>, %38, %cst_11 [1] : vector<16x16xf32> to vector<16xf32>
    %40 = vector.shape_cast %39 : vector<16xf32> to vector<16x1xf32>
    %41 = vector.broadcast %40 : vector<16x1xf32> to vector<16x16xf32>
    %42 = arith.subf %38, %41 : vector<16x16xf32>
    %43 = math.exp %42 : vector<16x16xf32>
    %cst_12 = arith.constant dense<0.000000e+00> : vector<16xf32>
    %44 = vector.multi_reduction <add>, %43, %cst_12 [1] : vector<16x16xf32> to vector<16xf32>
    %45 = vector.shape_cast %44 : vector<16xf32> to vector<16x1xf32>
    %46 = tpu.reciprocal %45 {approx = true} : vector<16x1xf32> -> vector<16x1xf32>
    %47 = vector.broadcast %46 : vector<16x1xf32> to vector<16x16xf32>
    %48 = arith.mulf %43, %47 : vector<16x16xf32>
    %49 = arith.truncf %48 : vector<16x16xf32> to vector<16x16xbf16>
    %cst_13 = arith.constant dense<0.000000e+00> : vector<16x8xf32>
    %50 = tpu.matmul %49, %36, %cst_13 {dimension_numbers = #tpu.dot_dimension_numbers<[1], [0], [0], [1], [0, 0, 1, 1], [], []>} : vector<16x16xbf16>, vector<16x8xbf16>, vector<16x8xf32> -> vector<16x8xf32>
    %51 = arith.truncf %50 : vector<16x8xf32> to vector<16x8xbf16>
    %52 = vector.extract_strided_slice %1 {offsets = [0, 96], sizes = [8, 32], strides = [1, 1]} : vector<32x128xbf16> to vector<8x32xbf16>
    %cst_14 = arith.constant dense<0.000000e+00> : vector<16x32xf32>
    %53 = tpu.matmul %51, %52, %cst_14 {dimension_numbers = #tpu.dot_dimension_numbers<[1], [0], [0], [1], [0, 0, 1, 1], [], []>} : vector<16x8xbf16>, vector<8x32xbf16>, vector<16x32xf32> -> vector<16x32xf32>
    %54 = vector.extract_strided_slice %29 {offsets = [0, 8], sizes = [16, 8], strides = [1, 1]} : vector<16x32xbf16> to vector<16x8xbf16>
    %55 = vector.extract_strided_slice %31 {offsets = [0, 8], sizes = [16, 8], strides = [1, 1]} : vector<16x32xbf16> to vector<16x8xbf16>
    %56 = vector.extract_strided_slice %33 {offsets = [0, 8], sizes = [16, 8], strides = [1, 1]} : vector<16x32xbf16> to vector<16x8xbf16>
    %cst_15 = arith.constant dense<0.000000e+00> : vector<16x16xf32>
    %57 = tpu.matmul %54, %55, %cst_15 {dimension_numbers = #tpu.dot_dimension_numbers<[1], [1], [0], [0], [0, 0, 1, 0], [], []>} : vector<16x8xbf16>, vector<16x8xbf16>, vector<16x16xf32> -> vector<16x16xf32>
    %58 = arith.addf %57, %5 : vector<16x16xf32>
    %cst_16 = arith.constant dense<0xFF800000> : vector<16xf32>
    %59 = vector.multi_reduction <maximumf>, %58, %cst_16 [1] : vector<16x16xf32> to vector<16xf32>
    %60 = vector.shape_cast %59 : vector<16xf32> to vector<16x1xf32>
    %61 = vector.broadcast %60 : vector<16x1xf32> to vector<16x16xf32>
    %62 = arith.subf %58, %61 : vector<16x16xf32>
    %63 = math.exp %62 : vector<16x16xf32>
    %cst_17 = arith.constant dense<0.000000e+00> : vector<16xf32>
    %64 = vector.multi_reduction <add>, %63, %cst_17 [1] : vector<16x16xf32> to vector<16xf32>
    %65 = vector.shape_cast %64 : vector<16xf32> to vector<16x1xf32>
    %66 = tpu.reciprocal %65 {approx = true} : vector<16x1xf32> -> vector<16x1xf32>
    %67 = vector.broadcast %66 : vector<16x1xf32> to vector<16x16xf32>
    %68 = arith.mulf %63, %67 : vector<16x16xf32>
    %69 = arith.truncf %68 : vector<16x16xf32> to vector<16x16xbf16>
    %cst_18 = arith.constant dense<0.000000e+00> : vector<16x8xf32>
    %70 = tpu.matmul %69, %56, %cst_18 {dimension_numbers = #tpu.dot_dimension_numbers<[1], [0], [0], [1], [0, 0, 1, 1], [], []>} : vector<16x16xbf16>, vector<16x8xbf16>, vector<16x8xf32> -> vector<16x8xf32>
    %71 = arith.truncf %70 : vector<16x8xf32> to vector<16x8xbf16>
    %72 = vector.extract_strided_slice %1 {offsets = [8, 96], sizes = [8, 32], strides = [1, 1]} : vector<32x128xbf16> to vector<8x32xbf16>
    %cst_19 = arith.constant dense<0.000000e+00> : vector<16x32xf32>
    %73 = tpu.matmul %71, %72, %cst_19 {dimension_numbers = #tpu.dot_dimension_numbers<[1], [0], [0], [1], [0, 0, 1, 1], [], []>} : vector<16x8xbf16>, vector<8x32xbf16>, vector<16x32xf32> -> vector<16x32xf32>
    %74 = arith.addf %53, %73 : vector<16x32xf32>
    %75 = vector.extract_strided_slice %29 {offsets = [0, 16], sizes = [16, 8], strides = [1, 1]} : vector<16x32xbf16> to vector<16x8xbf16>
    %76 = vector.extract_strided_slice %31 {offsets = [0, 16], sizes = [16, 8], strides = [1, 1]} : vector<16x32xbf16> to vector<16x8xbf16>
    %77 = vector.extract_strided_slice %33 {offsets = [0, 16], sizes = [16, 8], strides = [1, 1]} : vector<16x32xbf16> to vector<16x8xbf16>
    %cst_20 = arith.constant dense<0.000000e+00> : vector<16x16xf32>
    %78 = tpu.matmul %75, %76, %cst_20 {dimension_numbers = #tpu.dot_dimension_numbers<[1], [1], [0], [0], [0, 0, 1, 0], [], []>} : vector<16x8xbf16>, vector<16x8xbf16>, vector<16x16xf32> -> vector<16x16xf32>
    %79 = arith.addf %78, %5 : vector<16x16xf32>
    %cst_21 = arith.constant dense<0xFF800000> : vector<16xf32>
    %80 = vector.multi_reduction <maximumf>, %79, %cst_21 [1] : vector<16x16xf32> to vector<16xf32>
    %81 = vector.shape_cast %80 : vector<16xf32> to vector<16x1xf32>
    %82 = vector.broadcast %81 : vector<16x1xf32> to vector<16x16xf32>
    %83 = arith.subf %79, %82 : vector<16x16xf32>
    %84 = math.exp %83 : vector<16x16xf32>
    %cst_22 = arith.constant dense<0.000000e+00> : vector<16xf32>
    %85 = vector.multi_reduction <add>, %84, %cst_22 [1] : vector<16x16xf32> to vector<16xf32>
    %86 = vector.shape_cast %85 : vector<16xf32> to vector<16x1xf32>
    %87 = tpu.reciprocal %86 {approx = true} : vector<16x1xf32> -> vector<16x1xf32>
    %88 = vector.broadcast %87 : vector<16x1xf32> to vector<16x16xf32>
    %89 = arith.mulf %84, %88 : vector<16x16xf32>
    %90 = arith.truncf %89 : vector<16x16xf32> to vector<16x16xbf16>
    %cst_23 = arith.constant dense<0.000000e+00> : vector<16x8xf32>
    %91 = tpu.matmul %90, %77, %cst_23 {dimension_numbers = #tpu.dot_dimension_numbers<[1], [0], [0], [1], [0, 0, 1, 1], [], []>} : vector<16x16xbf16>, vector<16x8xbf16>, vector<16x8xf32> -> vector<16x8xf32>
    %92 = arith.truncf %91 : vector<16x8xf32> to vector<16x8xbf16>
    %93 = vector.extract_strided_slice %1 {offsets = [16, 96], sizes = [8, 32], strides = [1, 1]} : vector<32x128xbf16> to vector<8x32xbf16>
    %cst_24 = arith.constant dense<0.000000e+00> : vector<16x32xf32>
    %94 = tpu.matmul %92, %93, %cst_24 {dimension_numbers = #tpu.dot_dimension_numbers<[1], [0], [0], [1], [0, 0, 1, 1], [], []>} : vector<16x8xbf16>, vector<8x32xbf16>, vector<16x32xf32> -> vector<16x32xf32>
    %95 = arith.addf %74, %94 : vector<16x32xf32>
    %96 = vector.extract_strided_slice %29 {offsets = [0, 24], sizes = [16, 8], strides = [1, 1]} : vector<16x32xbf16> to vector<16x8xbf16>
    %97 = vector.extract_strided_slice %31 {offsets = [0, 24], sizes = [16, 8], strides = [1, 1]} : vector<16x32xbf16> to vector<16x8xbf16>
    %98 = vector.extract_strided_slice %33 {offsets = [0, 24], sizes = [16, 8], strides = [1, 1]} : vector<16x32xbf16> to vector<16x8xbf16>
    %cst_25 = arith.constant dense<0.000000e+00> : vector<16x16xf32>
    %99 = tpu.matmul %96, %97, %cst_25 {dimension_numbers = #tpu.dot_dimension_numbers<[1], [1], [0], [0], [0, 0, 1, 0], [], []>} : vector<16x8xbf16>, vector<16x8xbf16>, vector<16x16xf32> -> vector<16x16xf32>
    %100 = arith.addf %99, %5 : vector<16x16xf32>
    %cst_26 = arith.constant dense<0xFF800000> : vector<16xf32>
    %101 = vector.multi_reduction <maximumf>, %100, %cst_26 [1] : vector<16x16xf32> to vector<16xf32>
    %102 = vector.shape_cast %101 : vector<16xf32> to vector<16x1xf32>
    %103 = vector.broadcast %102 : vector<16x1xf32> to vector<16x16xf32>
    %104 = arith.subf %100, %103 : vector<16x16xf32>
    %105 = math.exp %104 : vector<16x16xf32>
    %cst_27 = arith.constant dense<0.000000e+00> : vector<16xf32>
    %106 = vector.multi_reduction <add>, %105, %cst_27 [1] : vector<16x16xf32> to vector<16xf32>
    %107 = vector.shape_cast %106 : vector<16xf32> to vector<16x1xf32>
    %108 = tpu.reciprocal %107 {approx = true} : vector<16x1xf32> -> vector<16x1xf32>
    %109 = vector.broadcast %108 : vector<16x1xf32> to vector<16x16xf32>
    %110 = arith.mulf %105, %109 : vector<16x16xf32>
    %111 = arith.truncf %110 : vector<16x16xf32> to vector<16x16xbf16>
    %cst_28 = arith.constant dense<0.000000e+00> : vector<16x8xf32>
    %112 = tpu.matmul %111, %98, %cst_28 {dimension_numbers = #tpu.dot_dimension_numbers<[1], [0], [0], [1], [0, 0, 1, 1], [], []>} : vector<16x16xbf16>, vector<16x8xbf16>, vector<16x8xf32> -> vector<16x8xf32>
    %113 = arith.truncf %112 : vector<16x8xf32> to vector<16x8xbf16>
    %114 = vector.extract_strided_slice %1 {offsets = [24, 96], sizes = [8, 32], strides = [1, 1]} : vector<32x128xbf16> to vector<8x32xbf16>
    %cst_29 = arith.constant dense<0.000000e+00> : vector<16x32xf32>
    %115 = tpu.matmul %113, %114, %cst_29 {dimension_numbers = #tpu.dot_dimension_numbers<[1], [0], [0], [1], [0, 0, 1, 1], [], []>} : vector<16x8xbf16>, vector<8x32xbf16>, vector<16x32xf32> -> vector<16x32xf32>
    %116 = arith.addf %95, %115 : vector<16x32xf32>
    %117 = vector.extract_strided_slice %3 {offsets = [0, 96], sizes = [1, 32], strides = [1, 1]} : vector<1x128xf32> to vector<1x32xf32>
    %118 = vector.broadcast %117 : vector<1x32xf32> to vector<16x32xf32>
    %119 = arith.addf %116, %118 : vector<16x32xf32>
    %120 = arith.addf %0, %119 : vector<16x32xf32>
    %cst_30 = arith.constant dense<0.000000e+00> : vector<16xf32>
    %121 = vector.multi_reduction <add>, %120, %cst_30 [1] : vector<16x32xf32> to vector<16xf32>
    %122 = vector.shape_cast %121 : vector<16xf32> to vector<16x1xf32>
    %cst_31 = arith.constant 3.200000e+01 : f32
    %123 = vector.broadcast %cst_31 : f32 to vector<16x1xf32>
    %124 = arith.divf %122, %123 : vector<16x1xf32>
    %125 = vector.broadcast %124 : vector<16x1xf32> to vector<16x32xf32>
    %126 = arith.subf %120, %125 : vector<16x32xf32>
    %127 = arith.mulf %126, %126 : vector<16x32xf32>
    %cst_32 = arith.constant dense<0.000000e+00> : vector<16xf32>
    %128 = vector.multi_reduction <add>, %127, %cst_32 [1] : vector<16x32xf32> to vector<16xf32>
    %129 = vector.shape_cast %128 : vector<16xf32> to vector<16x1xf32>
    %cst_33 = arith.constant 3.200000e+01 : f32
    %130 = vector.broadcast %cst_33 : f32 to vector<16x1xf32>
    %131 = arith.divf %129, %130 : vector<16x1xf32>
    %132 = vector.broadcast %124 : vector<16x1xf32> to vector<16x32xf32>
    %133 = arith.subf %120, %132 : vector<16x32xf32>
    %cst_34 = arith.constant 9.99999974E-6 : f32
    %134 = vector.broadcast %cst_34 : f32 to vector<16x1xf32>
    %135 = arith.addf %131, %134 : vector<16x1xf32>
    %136 = math.rsqrt %135 : vector<16x1xf32>
    %137 = vector.broadcast %136 : vector<16x1xf32> to vector<16x32xf32>
    %138 = arith.mulf %133, %137 : vector<16x32xf32>
    %139 = arith.truncf %138 : vector<16x32xf32> to vector<16x32xbf16>
    %c0_35 = arith.constant 0 : index
    %c0_36 = arith.constant 0 : index
    %140 = vector.load %arg2[%c0_35, %c0_36] : memref<32x64xbf16, #tpu.memory_space<vmem>>, vector<32x64xbf16>
    %cst_37 = arith.constant dense<0.000000e+00> : vector<16x64xf32>
    %141 = tpu.matmul %139, %140, %cst_37 {dimension_numbers = #tpu.dot_dimension_numbers<[1], [0], [0], [1], [0, 0, 1, 1], [], []>} : vector<16x32xbf16>, vector<32x64xbf16>, vector<16x64xf32> -> vector<16x64xf32>
    %142 = vector.extract_strided_slice %4 {offsets = [0, 0], sizes = [1, 64], strides = [1, 1]} : vector<1x128xf32> to vector<1x64xf32>
    %143 = vector.broadcast %142 : vector<1x64xf32> to vector<16x64xf32>
    %144 = arith.addf %141, %143 : vector<16x64xf32>
    %cst_38 = arith.constant 0.000000e+00 : f32
    %145 = vector.broadcast %cst_38 : f32 to vector<16x64xf32>
    %146 = arith.maximumf %144, %145 : vector<16x64xf32>
    %147 = arith.truncf %146 : vector<16x64xf32> to vector<16x64xbf16>
    %c0_39 = arith.constant 0 : index
    %c0_40 = arith.constant 0 : index
    %148 = vector.load %arg3[%c0_39, %c0_40] : memref<64x32xbf16, #tpu.memory_space<vmem>>, vector<64x32xbf16>
    %cst_41 = arith.constant dense<0.000000e+00> : vector<16x32xf32>
    %149 = tpu.matmul %147, %148, %cst_41 {dimension_numbers = #tpu.dot_dimension_numbers<[1], [0], [0], [1], [0, 0, 1, 1], [], []>} : vector<16x64xbf16>, vector<64x32xbf16>, vector<16x32xf32> -> vector<16x32xf32>
    %150 = vector.extract_strided_slice %4 {offsets = [0, 64], sizes = [1, 32], strides = [1, 1]} : vector<1x128xf32> to vector<1x32xf32>
    %151 = vector.broadcast %150 : vector<1x32xf32> to vector<16x32xf32>
    %152 = arith.addf %149, %151 : vector<16x32xf32>
    %153 = arith.addf %120, %152 : vector<16x32xf32>
    %c0_42 = arith.constant 0 : index
    %c0_43 = arith.constant 0 : index
    %154 = vector.load %arg5[%c0_42, %c0_43] : memref<16x32xf32, #tpu.memory_space<vmem>>, vector<16x32xf32>
    tpu.vector_store %arg5[%c0_42, %c0_43], %153 {strides = array<i32>} : memref<16x32xf32, #tpu.memory_space<vmem>>, vector<16x32xf32>,
    return
  }
}

</mosaic_0001>

<bundles_post_ra>
// kernel: self_attention_decoder_layer.1
= control target key start
LH: loop header
LB: loop body
LE: loop exit
PB: predicated region body
PF: predicated region fallthrough
CT: control target
= control target key end

     0   :  { %10 = vsyncpa [#allocation3], 0  ;;  %s1624_s0 = inlined_call_operand.vmem [shape: f32[16,32], index: 0, kind: input, shape index: {}]   ;;  %s1625_s1 = inlined_call_operand.hbm [shape: bf16[32,128], index: 1, kind: input, shape index: {}]   ;;  %s1626_s2 = inlined_call_operand.vmem [shape: bf16[32,64], index: 2, kind: input, shape index: {}]   ;;  %s1627_s3 = inlined_call_operand.vmem [shape: bf16[64,32], index: 3, kind: input, shape index: {}]   ;;  %s1628_s4 = inlined_call_operand.vmem [shape: f32[24,128], index: 4, kind: input, shape index: {}]   ;;  %s1629_s5 = inlined_call_operand.hbm [shape: f32[16,32], index: 5, kind: output, shape index: {}]  }
   0x1   :  { %11 = vsyncpa [#allocation4], 0  ;;  %s1314_s18 = smov [#allocation2]   ;;  %s1266_s22 = scalar_lea.hbm %s1625_s1, 256 }
   0x2   :  { %s19_s19 = sshll.u32 %s1314_s18, 4  ;;  %p1267_p0 = scmp.ne.s32.totalorder %s1625_s1, %s1266_s22  ;;  %s20_s19 = int_to_ptr.vmem [resolvable:$true] %s19_s19 }
   0x3   :  { %p1270_p1 = scmp.lt.u32.totalorder %s1266_s22, %s1625_s1 }
   0x5   :  { %p1272_p2 = pnand %p1270_p1, %p1267_p0 }
   0x7   :  { %1275 = shalt.err (!%p1272_p2)
}
   0x8   :  { %s1276_s27 = scalar_lea.vmem %s20_s19, 256  ;;  %p1281_p4 = scmp.lt.s32.totalorder %s20_s19, %s20_s19 }
   0x9   :  { %p1277_p3 = scmp.ne.s32.totalorder %s20_s19, %s1276_s27  ;;  %p1282_p5 = scmp.lt.s32.totalorder %s1276_s27, %s1276_s27 }
   0xb   :  { %p1283_p6 = por %p1282_p5, %p1281_p4 }
   0xd   :  { %p1284_p7 = pnand %p1283_p6, %p1277_p3 }
   0xf   :  { %1287 = shalt.err (!%p1284_p7)
}
  0x10   :  { %s1315_s28 = smov 64   ;;  %s1316_s29 = smov 4  }
  0x11   :  { %25 = dma.hbm_to_vmem [thread:$0]  %s1625_s1, 256, %s20_s19, [#allocation3], %s1315_s28, %s1315_s28, %s1316_s29  }
  0x12   :  { %1310 = dma.done.wait [#allocation3], 256  }
  0x13   :  { %1311 = vsyncadd [#allocation3], 4294967040  ;;  %vm45_vm0 = vcmask 261120   ;;  %v1380_v0 = vld [vmem:[%s1624_s0] sm:$0xff]  ;;  %v1385_v1 = vld [vmem:[%s1624_s0 + $0x8] sm:$0xff]  ;;  %v1317_v16 = vmov 0.0   ;;  %v74_v32 = vlaneseq }
  0x14   :  { %v46_v2 = vsel %vm45_vm0, %v1380_v0, 0.0  ;;  %v49_v3 = vsel %vm45_vm0, %v1385_v1, 0.0  ;;  %v1395_v14 = vld [vmem:[#allocation2] sm:$0xf]  ;;  %v1397_v15 = vld [vmem:[#allocation2 + $0x4] sm:$0xf]  ;;  %1095 = vmatprep.subr.bf16.mxu1 %v1317_v16  ;;  %1109 = vmatprep.subr.bf16.mxu0 %v1317_v16 }
  0x15   :  { %47 = vadd.xlane.f32.xlu0 %v46_v2  ;;  %v1033_v17 = vcombine.low %v1395_v14, %v1397_v15  ;;  %v1402_v18 = vld [vmem:[#allocation2 + $0x8] sm:$0xf]  ;;  %v1404_v19 = vld [vmem:[#allocation2 + $0xc] sm:$0xf]  ;;  %vm1318_vm1 = vmmov 0   ;;  %v1418_v33 = vshrl.u32 %v74_v32, 7 }
  0x16   :  { %1099 = vmatprep.mubr.msk.bf16.mxu1 %vm1318_vm1, %v1317_v16  ;;  %1111 = vmatprep.mubr.msk.bf16.mxu0 %vm1318_vm1, %v1317_v16  ;;  %v1034_v20 = vcombine.low %v1402_v18, %v1404_v19  ;;  %v1424_v35 = vld [vmem:[%s1628_s4] sm:$0xff]  ;;  %s1319_s11 = smov 88   ;;  %s1320_s12 = smov 96   ;;  %vm138_vm2 = vcmask 64512   ;;  %v1450_v49 = vld [vmem:[%s1628_s4 + $0x8] sm:$0xff]  ;;  %v1455_v51 = vld [vmem:[%s1628_s4 + $0x10] sm:$0xff] }
  0x17   :  { %1096 = vmatpush3.bf16.msra.mxu1 %v1033_v17  ;;  %v76_v34 = vsub.s32 0, %v1418_v33  ;;  %s1321_s13 = smov 120   ;;  %vm186_vm3 = vcmask 130048   ;;  %s1322_s4 = smov 32   ;;  %vm386_vm4 = vcmask 1043456   ;;  %vm967_vm5 = vcmask 523264  }
  0x18   :  { %1097 = vmatprep.subr.bf16.mxu1 %v1317_v16  ;;  %s1323_s18 = smov 80   ;;  %s1324_s19 = smov 56  }
  0x19   :  { %50 = vadd.xlane.f32.xlu0 %v49_v3  ;;  %v1427_v36 = vrot.slane %v1424_v35, %v76_v34  ;;  %s1325_s20 = smov 112   ;;  %s1326_s21 = smov 48  }
  0x1a   :  { %s1327_s22 = smov 72   ;;  %s1328_s23 = smov 104  }
  0x1b   :  { %1098 = vmatpush3.bf16.msra.mxu1 %v1034_v20  ;;  %s1329_s24 = smov 40   ;;  %s1330_s0 = smov [#allocation5]  }
  0x1c   :  { %1103 = vmatprep.subr.bf16.mxu1 %v1317_v16  ;;  %s1021_s1 = sshll.u32 %s1330_s0, 4  ;;  %s1022_s1 = int_to_ptr.vmem [resolvable:$true] %s1021_s1 }
  0x1d   :  { %p1293_p9 = scmp.lt.s32.totalorder %s1022_s1, %s1022_s1 }
  0xa2   :  { %v48_v4 = vpop.xlane.xlu0 %47 }
  0xa3   :  { %v53_v5 = vmul.f32 0.03125, %v48_v4 }
  0xa5   :  { %v55_v6 = vsub.f32 %v1380_v0, %v53_v5 }
  0xa6   :  { %v51_v7 = vpop.xlane.xlu0 %50 }
  0xa7   :  { %v54_v8 = vmul.f32 0.03125, %v51_v7  ;;  %v57_v9 = vmul.f32 %v55_v6, %v55_v6 }
  0xa9   :  { %v56_v10 = vsub.f32 %v1385_v1, %v54_v8  ;;  %v59_v11 = vsel %vm45_vm0, %v57_v9, 0.0 }
  0xaa   :  { %60 = vadd.xlane.f32.xlu1 %v59_v11 }
  0xab   :  { %v58_v12 = vmul.f32 %v56_v10, %v56_v10 }
  0xad   :  { %v62_v13 = vsel %vm45_vm0, %v58_v12, 0.0 }
  0xae   :  { %63 = vadd.xlane.f32.xlu1 %v62_v13 }
 0x137   :  { %v61_v21 = vpop.xlane.xlu1 %60 }
 0x138   :  { %v65_v22 = vmul.f32 0.03125, %v61_v21 }
 0x13a   :  { %v67_v23 = vadd.f32 1e-05, %v65_v22 }
 0x13b   :  { %v64_v24 = vpop.xlane.xlu1 %63 }
 0x13c   :  { %v66_v25 = vmul.f32 0.03125, %v64_v24  ;;  %1226 = vrsqrt.f32 %v67_v23 }
 0x13e   :  { %v68_v26 = vadd.f32 1e-05, %v66_v25 }
 0x140   :  { %1228 = vrsqrt.f32 %v68_v26 }
 0x146   :  { %v1227_v27 = vpop.eup %1226 }
 0x147   :  { %v71_v29 = vmul.f32 %v1227_v27, %v55_v6 }
 0x14a   :  { %v1229_v28 = vpop.eup %1228 }
 0x14b   :  { %v72_v30 = vmul.f32 %v1229_v28, %v56_v10 }
 0x14d   :  { %v73_v31 = vpack.c.bf16 %v72_v30, %v71_v29  ;;  %v1040_v30 = vcombine.low %v1397_v15, %v1397_v15 }
 0x14f   :  { %1100 = vmatmul.mubr.msk.bf16.vlgmr.msra.gmra.mrb[0].mxu1 %vm45_vm0, %v73_v31 }
 0x150   :  { %1105 = vmatprep.mubr.msk.bf16.mxu1 %vm1318_vm1, %v1317_v16 }
 0x222   :  { %v127_v37 = vpop.f32.mrb[0].mxu1 }
 0x223   :  { %v1101_v38 = vpop.f32.mrb[1].mxu1  ;;  %v128_v40 = vadd.f32 %v127_v37, %v1427_v36 }
 0x224   :  { %v130_v39 = vpop.f32.mrb[2].mxu1 }
 0x225   :  { %v131_v41 = vadd.f32 %v130_v39, %v1427_v36  ;;  %v1102_v42 = vpop.f32.mrb[3].mxu1 }
 0x227   :  { %v1431_v43 = vpack.c.bf16 %v131_v41, %v128_v40 }
 0x229   :  { %260 = vrot.lane.b32.xlu1 %v1431_v43, %s1319_s11  ;;  %136 = vrot.lane.b32.xlu0 %v1431_v43, %s1320_s12 }
 0x22d   :  { %258 = vrot.lane.b32.xlu1 %v1431_v43, %s1321_s13 }
 0x29b   :  { %v137_v44 = vpop.permute.xlu0 %136  ;;  %v261_v46 = vpop.permute.xlu1 %260 }
 0x29c   :  { %v143_v45 = vsel %vm138_vm2, %v137_v44, 0  ;;  %v266_v47 = vsel %vm138_vm2, %v261_v46, 0 }
 0x29d   :  { %1104 = vmatpush3.bf16.xpose.msra.mxu1 %v143_v45 }
 0x29e   :  { %1115 = vmatprep.subr.bf16.mxu1 %v1317_v16 }
 0x29f   :  { %v259_v48 = vpop.permute.xlu1 %258 }
 0x2a4   :  { %1106 = vmatmul.mubr.msk.bf16.vlgmr.msra.gmra.mrb[4].mxu1 %vm138_vm2, %v1431_v43 }
 0x2a5   :  { %1116 = vmatpush3.bf16.xpose.msra.mxu1 %v266_v47  ;;  %1117 = vmatprep.mubr.msk.bf16.mxu1 %vm1318_vm1, %v1317_v16 }
 0x2a6   :  { %1127 = vmatprep.subr.bf16.mxu1 %v1317_v16 }
 0x2ac   :  { %1118 = vmatmul.mubr.msk.bf16.vlgmr.msra.gmra.mrb[8].mxu1 %vm138_vm2, %v259_v48 }
 0x2ad   :  { %1129 = vmatprep.mubr.msk.bf16.mxu1 %vm1318_vm1, %v1317_v16 }
 0x377   :  { %v179_v50 = vpop.f32.mrb[4].mxu1 }
 0x378   :  { %v180_v52 = vadd.f32 %v179_v50, %v1450_v49  ;;  %v1107_v53 = vpop.f32.mrb[5].mxu1 }
 0x379   :  { %v182_v54 = vpop.f32.mrb[6].mxu1 }
 0x37a   :  { %v183_v55 = vadd.f32 %v182_v54, %v1455_v51  ;;  %v1108_v56 = vpop.f32.mrb[7].mxu1  ;;  %v187_v57 = vsel %vm186_vm3, %v180_v52, -inf }
 0x37b   :  { %188 = vmax.xlane.f32.xlu1 %v187_v57 }
 0x37c   :  { %v190_v58 = vsel %vm186_vm3, %v183_v55, -inf }
 0x37d   :  { %191 = vmax.xlane.f32.xlu0 %v190_v58 }
 0x37f   :  { %v302_v59 = vpop.f32.mrb[8].mxu1 }
 0x380   :  { %v303_v60 = vadd.f32 %v302_v59, %v1450_v49  ;;  %v1119_v61 = vpop.f32.mrb[9].mxu1 }
 0x381   :  { %v305_v62 = vpop.f32.mrb[10].mxu1 }
 0x382   :  { %v306_v63 = vadd.f32 %v305_v62, %v1455_v51  ;;  %v1120_v2 = vpop.f32.mrb[11].mxu1  ;;  %v309_v3 = vsel %vm186_vm3, %v303_v60, -inf }
 0x383   :  { %310 = vmax.xlane.f32.xlu0 %v309_v3 }
 0x384   :  { %v312_v4 = vsel %vm186_vm3, %v306_v63, -inf }
 0x387   :  { %313 = vmax.xlane.f32.xlu0 %v312_v4 }
 0x408   :  { %v189_v5 = vpop.xlane.xlu1 %188 }
 0x409   :  { %v193_v6 = vsub.f32 %v180_v52, %v189_v5 }
 0x40a   :  { %v192_v7 = vpop.xlane.xlu0 %191 }
 0x40b   :  { %v195_v8 = vmul.f32 1.442695, %v193_v6  ;;  %v194_v9 = vsub.f32 %v183_v55, %v192_v7 }
 0x40d   :  { %1230 = vpow2.f32 %v195_v8  ;;  %v197_v10 = vmul.f32 1.442695, %v194_v9 }
 0x40f   :  { %1232 = vpow2.f32 %v197_v10 }
 0x410   :  { %v311_v11 = vpop.xlane.xlu0 %310 }
 0x411   :  { %v315_v12 = vsub.f32 %v303_v60, %v311_v11 }
 0x413   :  { %v317_v13 = vmul.f32 1.442695, %v315_v12 }
 0x414   :  { %v314_v17 = vpop.xlane.xlu0 %313 }
 0x415   :  { %1234 = vpow2.f32 %v317_v13  ;;  %v316_v20 = vsub.f32 %v306_v63, %v314_v17 }
 0x417   :  { %v1231_v21 = vpop.eup %1230  ;;  %v319_v22 = vmul.f32 1.442695, %v316_v20 }
 0x418   :  { %v199_v23 = vsel %vm186_vm3, %v1231_v21, 0.0 }
 0x419   :  { %v1233_v24 = vpop.eup %1232  ;;  %1236 = vpow2.f32 %v319_v22  ;;  %200 = vadd.xlane.f32.xlu1 %v199_v23 }
 0x41a   :  { %v202_v25 = vsel %vm186_vm3, %v1233_v24, 0.0 }
 0x41b   :  { %203 = vadd.xlane.f32.xlu0 %v202_v25 }
 0x41f   :  { %v1235_v26 = vpop.eup %1234 }
 0x420   :  { %v321_v27 = vsel %vm186_vm3, %v1235_v26, 0.0 }
 0x421   :  { %322 = vadd.xlane.f32.xlu1 %v321_v27 }
 0x423   :  { %v1237_v28 = vpop.eup %1236 }
 0x424   :  { %v324_v29 = vsel %vm186_vm3, %v1237_v28, 0.0 }
 0x425   :  { %325 = vadd.xlane.f32.xlu0 %v324_v29 }
 0x432   :  { %210 = vrot.lane.b32.xlu1 %v1431_v43, %s1315_s28 }
 0x436   :  { %381 = vrot.lane.b32.xlu1 %v1040_v30, %s1322_s4 }
 0x43a   :  { %483 = vrot.lane.b32.xlu1 %v1431_v43, %s1323_s18 }
 0x43b   :  { %332 = vrot.lane.b32.xlu0 %v1431_v43, %s1324_s19 }
 0x43e   :  { %481 = vrot.lane.b32.xlu1 %v1431_v43, %s1325_s20 }
 0x4a6   :  { %v201_v31 = vpop.xlane.xlu1 %200 }
 0x4a7   :  { %1238 = vrcp.f32 %v201_v31 }
 0x4a8   :  { %v204_v32 = vpop.xlane.xlu0 %203 }
 0x4a9   :  { %1240 = vrcp.f32 %v204_v32  ;;  %v1042_v32 = vcombine.low %v1395_v14, %v1395_v14 }
 0x4ae   :  { %v323_v15 = vpop.xlane.xlu1 %322 }
 0x4af   :  { %1242 = vrcp.f32 %v323_v15 }
 0x4b1   :  { %v1239_v34 = vpop.eup %1238 }
 0x4b2   :  { %v211_v37 = vpop.permute.xlu1 %210  ;;  %v326_v38 = vpop.xlane.xlu0 %325  ;;  %v207_v40 = vmul.f32 %v1239_v34, %v1231_v21 }
 0x4b3   :  { %v1241_v39 = vpop.eup %1240  ;;  %1244 = vrcp.f32 %v326_v38  ;;  %1110 = vmatpush3.bf16.msra.mxu0 %v211_v37 }
 0x4b4   :  { %1121 = vmatprep.subr.bf16.mxu0 %v1317_v16  ;;  %v208_v41 = vmul.f32 %v1241_v39, %v1233_v24 }
 0x4b6   :  { %v382_v42 = vpop.permute.xlu1 %381  ;;  %v333_v44 = vpop.permute.xlu0 %332  ;;  %v209_v45 = vpack.c.bf16 %v208_v41, %v207_v40 }
 0x4b7   :  { %v388_v46 = vsel %vm386_vm4, %v382_v42, 0 }
 0x4b8   :  { %1112 = vmatmul.mubr.msk.bf16.vlgmr.msra.gmra.mrb[0].mxu0 %vm186_vm3, %v209_v45  ;;  %1128 = vmatpush3.bf16.msra.mxu1 %v388_v46 }
 0x4b9   :  { %1122 = vmatpush3.bf16.msra.mxu0 %v333_v44  ;;  %1123 = vmatprep.mubr.msk.bf16.mxu0 %vm1318_vm1, %v1317_v16  ;;  %v1243_v47 = vpop.eup %1242 }
 0x4ba   :  { %1139 = vmatprep.subr.bf16.mxu1 %v1317_v16  ;;  %1133 = vmatprep.subr.bf16.mxu0 %v1317_v16  ;;  %v329_v50 = vmul.f32 %v1243_v47, %v1235_v26  ;;  %v484_v61 = vpop.permute.xlu1 %483 }
 0x4bb   :  { %v489_v3 = vsel %vm138_vm2, %v484_v61, 0 }
 0x4bd   :  { %v1245_v48 = vpop.eup %1244 }
 0x4be   :  { %v330_v52 = vmul.f32 %v1245_v48, %v1237_v28  ;;  %v482_v4 = vpop.permute.xlu1 %481 }
 0x4c0   :  { %v331_v53 = vpack.c.bf16 %v330_v52, %v329_v50 }
 0x4c2   :  { %1124 = vmatmul.mubr.msk.bf16.vlgmr.msra.gmra.mrb[4].mxu0 %vm186_vm3, %v331_v53 }
 0x4c3   :  { %1135 = vmatprep.mubr.msk.bf16.mxu0 %vm1318_vm1, %v1317_v16 }
 0x58b   :  { %v1487_v54 = vpop.f32.mrb[0].mxu0 }
 0x58c   :  { %v1113_v55 = vpop.f32.mrb[1].mxu0 }
 0x58d   :  { %v1489_v56 = vpop.f32.mrb[2].mxu0 }
 0x58e   :  { %v257_v57 = vpack.c.bf16 %v1489_v56, %v1487_v54  ;;  %v1114_v58 = vpop.f32.mrb[3].mxu0 }
 0x595   :  { %v372_v59 = vpop.f32.mrb[4].mxu0 }
 0x596   :  { %v1125_v60 = vpop.f32.mrb[5].mxu0 }
 0x597   :  { %v375_v62 = vpop.f32.mrb[6].mxu0 }
 0x598   :  { %v379_v63 = vpack.c.bf16 %v375_v62, %v372_v59  ;;  %v1126_v2 = vpop.f32.mrb[7].mxu0 }
 0x59a   :  { %1130 = vmatmul.mubr.msk.bf16.vlgmr.msra.gmra.mrb[12].mxu1 %vm138_vm2, %v379_v63 }
 0x59b   :  { %1140 = vmatpush3.bf16.xpose.msra.mxu1 %v489_v3  ;;  %1141 = vmatprep.mubr.msk.bf16.mxu1 %vm1318_vm1, %v1317_v16 }
 0x59c   :  { %1151 = vmatprep.subr.bf16.mxu1 %v1317_v16 }
 0x5a2   :  { %1142 = vmatmul.mubr.msk.bf16.vlgmr.msra.gmra.mrb[16].mxu1 %vm138_vm2, %v482_v4 }
 0x5a3   :  { %1153 = vmatprep.mubr.msk.bf16.mxu1 %vm1318_vm1, %v1317_v16 }
 0x66d   :  { %v1501_v5 = vpop.f32.mrb[12].mxu1 }
 0x66e   :  { %v1131_v6 = vpop.f32.mrb[13].mxu1 }
 0x66f   :  { %v1503_v7 = vpop.f32.mrb[14].mxu1 }
 0x670   :  { %v1132_v8 = vpop.f32.mrb[15].mxu1 }
 0x675   :  { %v525_v9 = vpop.f32.mrb[16].mxu1 }
 0x676   :  { %v526_v10 = vadd.f32 %v525_v9, %v1450_v49  ;;  %v1143_v11 = vpop.f32.mrb[17].mxu1 }
 0x677   :  { %v528_v12 = vpop.f32.mrb[18].mxu1 }
 0x678   :  { %v529_v13 = vadd.f32 %v528_v12, %v1455_v51  ;;  %v1144_v17 = vpop.f32.mrb[19].mxu1  ;;  %v532_v20 = vsel %vm186_vm3, %v526_v10, -inf }
 0x679   :  { %533 = vmax.xlane.f32.xlu0 %v532_v20  ;;  %v1046_v20 = vcombine.low %v1402_v18, %v1402_v18 }
 0x67a   :  { %v535_v21 = vsel %vm186_vm3, %v529_v13, -inf }
 0x67b   :  { %536 = vmax.xlane.f32.xlu1 %v535_v21 }
 0x68c   :  { %555 = vrot.lane.b32.xlu1 %v1431_v43, %s1326_s21 }
 0x690   :  { %657 = vrot.lane.b32.xlu1 %v1431_v43, %s1327_s22 }
 0x694   :  { %655 = vrot.lane.b32.xlu1 %v1431_v43, %s1328_s23 }
 0x706   :  { %v534_v22 = vpop.xlane.xlu0 %533 }
 0x707   :  { %v538_v23 = vsub.f32 %v526_v10, %v534_v22 }
 0x708   :  { %v537_v24 = vpop.xlane.xlu1 %536 }
 0x709   :  { %v540_v25 = vmul.f32 1.442695, %v538_v23  ;;  %v539_v26 = vsub.f32 %v529_v13, %v537_v24 }
 0x70b   :  { %1246 = vpow2.f32 %v540_v25  ;;  %v542_v27 = vmul.f32 1.442695, %v539_v26 }
 0x70c   :  { %v556_v40 = vpop.permute.xlu1 %555 }
 0x70d   :  { %1248 = vpow2.f32 %v542_v27 }
 0x710   :  { %v658_v45 = vpop.permute.xlu1 %657 }
 0x711   :  { %v663_v46 = vsel %vm138_vm2, %v658_v45, 0 }
 0x714   :  { %v656_v47 = vpop.permute.xlu1 %655 }
 0x715   :  { %v1247_v28 = vpop.eup %1246 }
 0x716   :  { %v544_v29 = vsel %vm186_vm3, %v1247_v28, 0.0 }
 0x717   :  { %v1249_v30 = vpop.eup %1248  ;;  %545 = vadd.xlane.f32.xlu0 %v544_v29 }
 0x718   :  { %v547_v31 = vsel %vm186_vm3, %v1249_v30, 0.0 }
 0x71b   :  { %548 = vadd.xlane.f32.xlu0 %v547_v31 }
 0x731   :  { %432 = vrot.lane.b32.xlu0 %v1042_v32, %s1322_s4 }
 0x7a4   :  { %v546_v15 = vpop.xlane.xlu0 %545 }
 0x7a5   :  { %1250 = vrcp.f32 %v546_v15 }
 0x7a8   :  { %v549_v34 = vpop.xlane.xlu0 %548 }
 0x7a9   :  { %1252 = vrcp.f32 %v549_v34 }
 0x7ac   :  { %v433_v37 = vpop.permute.xlu0 %432 }
 0x7ad   :  { %v438_v38 = vsel %vm386_vm4, %v433_v37, 0 }
 0x7ae   :  { %1134 = vmatpush3.bf16.msra.mxu0 %v438_v38 }
 0x7af   :  { %1145 = vmatprep.subr.bf16.mxu0 %v1317_v16  ;;  %v1251_v39 = vpop.eup %1250 }
 0x7b0   :  { %v552_v41 = vmul.f32 %v1251_v39, %v1247_v28 }
 0x7b1   :  { %1136 = vmatmul.mubr.msk.bf16.vlgmr.msra.gmra.mrb[8].mxu0 %vm138_vm2, %v257_v57 }
 0x7b2   :  { %1146 = vmatpush3.bf16.msra.mxu0 %v556_v40  ;;  %1147 = vmatprep.mubr.msk.bf16.mxu0 %vm1318_vm1, %v1317_v16 }
 0x7b3   :  { %v1253_v14 = vpop.eup %1252  ;;  %1157 = vmatprep.subr.bf16.mxu0 %v1317_v16 }
 0x7b4   :  { %v553_v42 = vmul.f32 %v1253_v14, %v1249_v30 }
 0x7b6   :  { %v554_v44 = vpack.c.bf16 %v553_v42, %v552_v41 }
 0x7b9   :  { %1148 = vmatmul.mubr.msk.bf16.vlgmr.msra.gmra.mrb[12].mxu0 %vm186_vm3, %v554_v44 }
 0x7ba   :  { %1159 = vmatprep.mubr.msk.bf16.mxu0 %vm1318_vm1, %v1317_v16 }
 0x7bb   :  { %1158 = vmatpush3.bf16.xpose.msra.mxu0 %v663_v46 }
 0x7bc   :  { %1169 = vmatprep.subr.bf16.mxu0 %v1317_v16 }
 0x7c2   :  { %1160 = vmatmul.mubr.msk.bf16.vlgmr.msra.gmra.mrb[16].mxu0 %vm138_vm2, %v656_v47 }
 0x7c3   :  { %1171 = vmatprep.mubr.msk.bf16.mxu0 %vm1318_vm1, %v1317_v16 }
 0x884   :  { %v474_v48 = vpop.f32.mrb[8].mxu0 }
 0x885   :  { %v1532_v50 = vadd.f32 %v474_v48, %v1501_v5  ;;  %v1137_v52 = vpop.f32.mrb[9].mxu0 }
 0x886   :  { %v477_v53 = vpop.f32.mrb[10].mxu0 }
 0x887   :  { %v1535_v54 = vadd.f32 %v477_v53, %v1503_v7  ;;  %v1138_v55 = vpop.f32.mrb[11].mxu0 }
 0x88c   :  { %v595_v56 = vpop.f32.mrb[12].mxu0 }
 0x88d   :  { %v1149_v57 = vpop.f32.mrb[13].mxu0 }
 0x88e   :  { %v598_v58 = vpop.f32.mrb[14].mxu0 }
 0x88f   :  { %v602_v59 = vpack.c.bf16 %v598_v58, %v595_v56  ;;  %v1150_v60 = vpop.f32.mrb[15].mxu0 }
 0x895   :  { %v699_v61 = vpop.f32.mrb[16].mxu0 }
 0x896   :  { %v700_v62 = vadd.f32 %v699_v61, %v1450_v49  ;;  %v1161_v63 = vpop.f32.mrb[17].mxu0 }
 0x897   :  { %v702_v2 = vpop.f32.mrb[18].mxu0 }
 0x898   :  { %v703_v3 = vadd.f32 %v702_v2, %v1455_v51  ;;  %v1162_v4 = vpop.f32.mrb[19].mxu0  ;;  %v706_v5 = vsel %vm186_vm3, %v700_v62, -inf }
 0x899   :  { %707 = vmax.xlane.f32.xlu0 %v706_v5  ;;  %v1220_v4 = vld [vmem:[%s1626_s2] sm:$0xff]   ;;  %v1221_v5 = vld [vmem:[%s1626_s2 + $0x8] sm:$0xff]  }
 0x89a   :  { %v709_v6 = vsel %vm186_vm3, %v703_v3, -inf }
 0x89b   :  { %710 = vmax.xlane.f32.xlu1 %v709_v6  ;;  %v1222_v6 = vld [vmem:[%s1627_s3] sm:$0xff]  }
 0x8ac   :  { %729 = vrot.lane.b32.xlu1 %v1431_v43, %s1329_s24  ;;  %v1050_v43 = vcombine.low %v1404_v19, %v1404_v19 }
 0x8b0   :  { %778 = vrot.lane.b32.xlu1 %v1050_v43, %s1322_s4 }
 0x8b4   :  { %830 = vrot.lane.b32.xlu1 %v1427_v36, %s1322_s4 }
 0x926   :  { %v708_v7 = vpop.xlane.xlu0 %707 }
 0x927   :  { %v712_v8 = vsub.f32 %v700_v62, %v708_v7  ;;  %v870_v7 = vsub.s32 1, %v1418_v33 }
 0x928   :  { %v711_v9 = vpop.xlane.xlu1 %710 }
 0x929   :  { %v714_v10 = vmul.f32 1.442695, %v712_v8  ;;  %v713_v11 = vsub.f32 %v703_v3, %v711_v9  ;;  %v1223_v8 = vld [vmem:[%s1627_s3 + $0x8] sm:$0xff]   ;;  %v871_v9 = vrot.slane %v1424_v35, %v870_v7 }
 0x92b   :  { %1254 = vpow2.f32 %v714_v10  ;;  %v716_v49 = vmul.f32 1.442695, %v713_v11 }
 0x92c   :  { %v730_v25 = vpop.permute.xlu1 %729 }
 0x92d   :  { %1256 = vpow2.f32 %v716_v49 }
 0x930   :  { %v779_v28 = vpop.permute.xlu1 %778 }
 0x931   :  { %v784_v29 = vsel %vm386_vm4, %v779_v28, 0 }
 0x932   :  { %1170 = vmatpush3.bf16.msra.mxu0 %v784_v29 }
 0x933   :  { %1183 = vmatprep.subr.bf16.mxu0 %v1317_v16 }
 0x934   :  { %v831_v44 = vpop.permute.xlu1 %830 }
 0x935   :  { %v1255_v12 = vpop.eup %1254 }
 0x936   :  { %v718_v51 = vsel %vm186_vm3, %v1255_v12, 0.0 }
 0x937   :  { %v1257_v13 = vpop.eup %1256  ;;  %719 = vadd.xlane.f32.xlu0 %v718_v51 }
 0x938   :  { %v721_v17 = vsel %vm186_vm3, %v1257_v13, 0.0 }
 0x93b   :  { %722 = vadd.xlane.f32.xlu0 %v721_v17 }
 0x951   :  { %604 = vrot.lane.b32.xlu0 %v1046_v20, %s1322_s4 }
 0x9c4   :  { %v720_v21 = vpop.xlane.xlu0 %719 }
 0x9c5   :  { %1258 = vrcp.f32 %v720_v21  ;;  %v1224_v21 = vld [vmem:[%s1627_s3 + $0x10] sm:$0xff]  }
 0x9c8   :  { %v723_v22 = vpop.xlane.xlu0 %722 }
 0x9c9   :  { %1260 = vrcp.f32 %v723_v22  ;;  %v1225_v22 = vld [vmem:[%s1627_s3 + $0x18] sm:$0xff]   ;;  %s1288_s3 = scalar_lea.vmem %s1022_s1, 256 }
 0x9ca   :  { %p1289_p8 = scmp.ne.s32.totalorder %s1022_s1, %s1288_s3  ;;  %p1294_p10 = scmp.lt.s32.totalorder %s1288_s3, %s1288_s3 }
 0x9cc   :  { %v605_v23 = vpop.permute.xlu0 %604  ;;  %p1295_p11 = por %p1294_p10, %p1293_p9 }
 0x9cd   :  { %v610_v24 = vsel %vm386_vm4, %v605_v23, 0 }
 0x9ce   :  { %1152 = vmatpush3.bf16.msra.mxu1 %v610_v24  ;;  %p1296_p12 = pnand %p1295_p11, %p1289_p8 }
 0x9cf   :  { %1163 = vmatprep.subr.bf16.mxu1 %v1317_v16  ;;  %v1259_v18 = vpop.eup %1258 }
 0x9d0   :  { %v726_v36 = vmul.f32 %v1259_v18, %v1255_v12 }
 0x9d1   :  { %1154 = vmatmul.mubr.msk.bf16.vlgmr.msra.gmra.mrb[20].mxu1 %vm138_vm2, %v602_v59 }
 0x9d2   :  { %1164 = vmatpush3.bf16.msra.mxu1 %v730_v25  ;;  %1165 = vmatprep.mubr.msk.bf16.mxu1 %vm1318_vm1, %v1317_v16 }
 0x9d3   :  { %v1261_v19 = vpop.eup %1260  ;;  %1175 = vmatprep.subr.bf16.mxu1 %v1317_v16 }
 0x9d4   :  { %v727_v26 = vmul.f32 %v1261_v19, %v1257_v13 }
 0x9d6   :  { %v728_v27 = vpack.c.bf16 %v727_v26, %v726_v36 }
 0x9d9   :  { %1166 = vmatmul.mubr.msk.bf16.vlgmr.msra.gmra.mrb[24].mxu1 %vm186_vm3, %v728_v27 }
 0x9da   :  { %1179 = vmatprep.mubr.msk.bf16.mxu1 %vm1318_vm1, %v1317_v16  ;;  %1176 = vmatpush3.bf16.msra.mxu1 %v1220_v4 }
 0x9db   :  { %1177 = vmatprep.subr.bf16.mxu1 %v1317_v16 }
 0x9de   :  { %1178 = vmatpush3.bf16.msra.mxu1 %v1221_v5 }
 0xaa4   :  { %v646_v30 = vpop.f32.mrb[20].mxu1 }
 0xaa5   :  { %v653_v31 = vadd.f32 %v646_v30, %v1532_v50  ;;  %v1155_v32 = vpop.f32.mrb[21].mxu1 }
 0xaa6   :  { %v649_v15 = vpop.f32.mrb[22].mxu1 }
 0xaa7   :  { %v654_v34 = vadd.f32 %v649_v15, %v1535_v54  ;;  %v1156_v37 = vpop.f32.mrb[23].mxu1 }
 0xaac   :  { %v769_v38 = vpop.f32.mrb[24].mxu1 }
 0xaad   :  { %v1167_v39 = vpop.f32.mrb[25].mxu1 }
 0xaae   :  { %v772_v40 = vpop.f32.mrb[26].mxu1 }
 0xaaf   :  { %v776_v14 = vpack.c.bf16 %v772_v40, %v769_v38  ;;  %v1168_v41 = vpop.f32.mrb[27].mxu1 }
 0xab1   :  { %1172 = vmatmul.mubr.msk.bf16.vlgmr.msra.gmra.mrb[20].mxu0 %vm138_vm2, %v776_v14 }
 0xab2   :  { %1191 = vmatprep.mubr.msk.bf16.mxu0 %vm1318_vm1, %v1317_v16  ;;  %1184 = vmatpush3.bf16.msra.mxu0 %v1222_v6 }
 0xab3   :  { %1185 = vmatprep.subr.bf16.mxu0 %v1317_v16 }
 0xab6   :  { %1186 = vmatpush3.bf16.msra.mxu0 %v1223_v8 }
 0xab7   :  { %1187 = vmatprep.subr.bf16.mxu0 %v1317_v16 }
 0xaba   :  { %1188 = vmatpush3.bf16.msra.mxu0 %v1224_v21 }
 0xabb   :  { %1189 = vmatprep.subr.bf16.mxu0 %v1317_v16 }
 0xabe   :  { %1190 = vmatpush3.bf16.msra.mxu0 %v1225_v22 }
 0xb84   :  { %v820_v42 = vpop.f32.mrb[20].mxu0 }
 0xb85   :  { %v827_v45 = vadd.f32 %v820_v42, %v653_v31  ;;  %v1173_v46 = vpop.f32.mrb[21].mxu0 }
 0xb86   :  { %v823_v47 = vpop.f32.mrb[22].mxu0 }
 0xb87   :  { %v833_v48 = vadd.f32 %v831_v44, %v827_v45  ;;  %v828_v50 = vadd.f32 %v823_v47, %v654_v34  ;;  %v1174_v52 = vpop.f32.mrb[23].mxu0 }
 0xb89   :  { %v1569_v53 = vadd.f32 %v833_v48, %v1380_v0  ;;  %v834_v54 = vadd.f32 %v831_v44, %v828_v50 }
 0xb8b   :  { %v1572_v55 = vadd.f32 %v834_v54, %v1385_v1  ;;  %v837_v56 = vsel %vm45_vm0, %v1569_v53, 0.0 }
 0xb8c   :  { %838 = vadd.xlane.f32.xlu0 %v837_v56 }
 0xb8d   :  { %v840_v57 = vsel %vm45_vm0, %v1572_v55, 0.0 }
 0xb8e   :  { %841 = vadd.xlane.f32.xlu1 %v840_v57 }
 0xc19   :  { %v839_v58 = vpop.xlane.xlu0 %838 }
 0xc1a   :  { %v843_v59 = vmul.f32 0.03125, %v839_v58 }
 0xc1b   :  { %v842_v60 = vpop.xlane.xlu1 %841 }
 0xc1c   :  { %v845_v61 = vsub.f32 %v1569_v53, %v843_v59  ;;  %v844_v62 = vmul.f32 0.03125, %v842_v60 }
 0xc1e   :  { %v846_v0 = vsub.f32 %v1572_v55, %v844_v62  ;;  %v847_v63 = vmul.f32 %v845_v61, %v845_v61 }
 0xc20   :  { %v849_v1 = vsel %vm45_vm0, %v847_v63, 0.0  ;;  %v848_v2 = vmul.f32 %v846_v0, %v846_v0 }
 0xc21   :  { %850 = vadd.xlane.f32.xlu0 %v849_v1 }
 0xc22   :  { %v852_v3 = vsel %vm45_vm0, %v848_v2, 0.0 }
 0xc25   :  { %853 = vadd.xlane.f32.xlu0 %v852_v3 }
 0xc3b   :  { %964 = vrot.lane.b32.xlu0 %v871_v9, %s1315_s28 }
 0xcae   :  { %v851_v10 = vpop.xlane.xlu0 %850 }
 0xcaf   :  { %v855_v11 = vmul.f32 0.03125, %v851_v10 }
 0xcb1   :  { %v857_v49 = vadd.f32 1e-05, %v855_v11 }
 0xcb2   :  { %v854_v12 = vpop.xlane.xlu0 %853 }
 0xcb3   :  { %v856_v51 = vmul.f32 0.03125, %v854_v12  ;;  %1262 = vrsqrt.f32 %v857_v49 }
 0xcb5   :  { %v858_v33 = vadd.f32 1e-05, %v856_v51 }
 0xcb6   :  { %v965_v29 = vpop.permute.xlu0 %964 }
 0xcb7   :  { %1264 = vrsqrt.f32 %v858_v33 }
 0xcbd   :  { %v1263_v13 = vpop.eup %1262 }
 0xcbe   :  { %v861_v20 = vmul.f32 %v1263_v13, %v845_v61 }
 0xcc1   :  { %v1265_v17 = vpop.eup %1264 }
 0xcc2   :  { %v862_v43 = vmul.f32 %v1265_v17, %v846_v0 }
 0xcc4   :  { %v863_v35 = vpack.c.bf16 %v862_v43, %v861_v20 }
 0xcc6   :  { %1180 = vmatmul.mubr.msk.bf16.vlgmr.msra.gmra.mrb[28].mxu1 %vm45_vm0, %v863_v35 }
 0xd99   :  { %v921_v23 = vpop.f32.mrb[28].mxu1 }
 0xd9a   :  { %v922_v24 = vadd.f32 %v921_v23, %v871_v9  ;;  %v1181_v18 = vpop.f32.mrb[29].mxu1 }
 0xd9b   :  { %v924_v25 = vpop.f32.mrb[30].mxu1 }
 0xd9c   :  { %v925_v19 = vadd.f32 %v924_v25, %v871_v9  ;;  %v1182_v36 = vpop.f32.mrb[31].mxu1  ;;  %v928_v26 = vmax.f32 %v922_v24, 0.0 }
 0xd9e   :  { %v929_v27 = vmax.f32 %v925_v19, 0.0 }
 0xda0   :  { %v930_v28 = vpack.c.bf16 %v929_v27, %v928_v26 }
 0xda2   :  { %1192 = vmatmul.mubr.msk.bf16.vlgmr.msra.gmra.mrb[24].mxu0 %vm967_vm5, %v930_v28 }
 0xe75   :  { %v1005_v30 = vpop.f32.mrb[24].mxu0 }
 0xe76   :  { %v1006_v31 = vadd.f32 %v1005_v30, %v965_v29  ;;  %v1193_v16 = vpop.f32.mrb[25].mxu0 }
 0xe77   :  { %v1008_v32 = vpop.f32.mrb[26].mxu0 }
 0xe78   :  { %v1012_v15 = vadd.f32 %v1006_v31, %v1569_v53  ;;  %v1009_v34 = vadd.f32 %v1008_v32, %v965_v29  ;;  %v1194_v37 = vpop.f32.mrb[27].mxu0 }
 0xe7a   :  { %1014 = vst.msk [vmem:[#allocation5] sm:$0xff] %vm45_vm0, %v1012_v15  ;;  %v1013_v38 = vadd.f32 %v1009_v34, %v1572_v55 }
 0xe7c   :  { %1015 = vst.msk [vmem:[#allocation5 + $0x8] sm:$0xff] %vm45_vm0, %v1013_v38 }
 0xe7d   :  { %1299 = shalt.err (!%p1296_p12)
}
 0xe7e   :  { %s1300_s13 = scalar_lea.hbm %s1629_s5, 256 }
 0xe7f   :  { %p1301_p13 = scmp.ne.s32.totalorder %s1629_s5, %s1300_s13  ;;  %p1304_p0 = scmp.lt.u32.totalorder %s1300_s13, %s1629_s5 }
 0xe81   :  { %p1306_p1 = pnand %p1304_p0, %p1301_p13 }
 0xe83   :  { %1309 = shalt.err (!%p1306_p1)
}
 0xe84   :  { %s1331_s4 = smov 128   ;;  %s1332_s18 = smov 8  }
 0xe85   :  { %1027 = dma.vmem_to_hbm [thread:$0]  %s1022_s1, 256, %s1629_s5, [#allocation4], %s1331_s4, %s1331_s4, %s1332_s18  }
 0xe86   :  { %1312 = dma.done.wait [#allocation4], 256  }
 0xe87   :  { %1313 = vsyncadd [#allocation4], 4294967040 }
 0xe88   :  { %1031 = vsyncpa [#allocation3], 1 }
 0xe89   :  { %1032 = vsyncpa [#allocation4], 1 }

</bundles_post_ra>
